<compile_context>
chip_gen: v7x
topology: tpu7x:2x2x1
jax: 0.10.0
libtpu: 0.0.40
codegen_flags: <defaults>
</compile_context>

<pallas_src>
import functools

import jax
import jax.numpy as jnp
from jax.experimental import pallas as pl
from jax.experimental.pallas import tpu as pltpu

_LANES = 128
_SUBLANES = 8


def _nll_kernel(pred_ref, logvar_ref, gt_ref, out_ref, *,
                eps, block_rows, tiles_per_core, valid_rows, needs_mask):
    j = pl.program_id(1)  # reduction axis (tiles handled by this core group)

    @pl.when(j == 0)
    def _init():
        out_ref[...] = jnp.zeros_like(out_ref)

    pred = pred_ref[...]
    gt = gt_ref[...]
    logvar = logvar_ref[...]

    if needs_mask:
        # Tail tiles may contain unspecified (OOB) or duplicated data; replace
        # it with values whose loss is exactly 0 BEFORE any log/exp.
        c = pl.program_id(0)
        tile_idx = c * tiles_per_core + j          # un-clamped logical tile
        row0 = tile_idx * block_rows
        row_idx = row0 + jax.lax.broadcasted_iota(
            jnp.int32, (block_rows, _LANES), 0)
        valid = row_idx < valid_rows
        pred = jnp.where(valid, pred, 1.0)
        gt = jnp.where(valid, gt, 1.0)
        logvar = jnp.where(valid, logvar, 0.0)

    pred = jnp.maximum(pred, eps)                  # torch.clamp(min=eps)
    gt = jnp.maximum(gt, eps)
    diff = jnp.log(gt) - jnp.log(pred)
    loss = 0.5 * jnp.exp(-logvar) * diff * diff + 0.5 * logvar

    if block_rows % _SUBLANES == 0:
        # Fold sublane-groups into the resident (8,128) accumulator: pure
        # VPU vreg adds, no per-step cross-lane reduce, no SMEM scalar RMW.
        out_ref[...] += jnp.sum(
            loss.reshape(block_rows // _SUBLANES, _SUBLANES, _LANES), axis=0)
    else:
        # Tiny inputs (rows not a multiple of 8): single sublane reduce.
        out_ref[0:1, :] += jnp.sum(loss, axis=0, keepdims=True)


def nll_log_loss(pred_depth, pred_logvar, gt_depth, eps=1e-6,
                 block_rows=1024):
    """Pallas implementation of NLLLogLoss.forward. Inputs: (B, 1, H, W)."""
    assert pred_depth.shape == pred_logvar.shape == gt_depth.shape

    n = int(pred_depth.size)
    n128 = ((n + _LANES - 1) // _LANES) * _LANES
    rows = n128 // _LANES

    def _prep(x, pad_value):
        flat = jnp.ravel(x).astype(jnp.float32)
        if n128 != n:  # minimal lane pad, only when n is not 128-aligned
            flat = jnp.pad(flat, (0, n128 - n), constant_values=pad_value)
        return flat.reshape(rows, _LANES)

    pred2d = _prep(pred_depth, 1.0)     # pad values give exactly 0 loss
    gt2d = _prep(gt_depth, 1.0)
    logvar2d = _prep(pred_logvar, 0.0)

    br = block_rows if rows > block_rows else rows  # full-dim block if small
    n_tiles = pl.cdiv(rows, br)
    num_cores = 2 if n_tiles >= 2 else 1            # v7x: shard across 2 TCs
    tiles_per_core = pl.cdiv(n_tiles, num_cores)
    covered_rows = num_cores * tiles_per_core * br
    needs_mask = covered_rows != rows

    def _in_index(c, j):
        # Clamp so the DMA of any over-reaching tail tile stays in bounds; the
        # kernel zeroes its contribution using the un-clamped index.
        t = c * tiles_per_core + j
        return (jnp.minimum(t, n_tiles - 1), 0)

    in_spec = pl.BlockSpec((br, _LANES), _in_index)

    kernel = functools.partial(
        _nll_kernel,
        eps=float(eps),                 # static Python float (no captured consts)
        block_rows=br,
        tiles_per_core=tiles_per_core,
        valid_rows=rows,
        needs_mask=needs_mask,
    )

    partials = pl.pallas_call(
        kernel,
        out_shape=jax.ShapeDtypeStruct((num_cores, _SUBLANES, _LANES),
                                       jnp.float32),
        grid_spec=pltpu.PrefetchScalarGridSpec(
            num_scalar_prefetch=0,
            grid=(num_cores, tiles_per_core),
            in_specs=[in_spec, in_spec, in_spec],
            # One resident accumulator block per core group.
            out_specs=pl.BlockSpec((None, _SUBLANES, _LANES),
                                   lambda c, j: (c, 0, 0)),
        ),
        compiler_params=pltpu.CompilerParams(
            dimension_semantics=("parallel", "arbitrary")),
    )(pred2d, logvar2d, gt2d)

    return jnp.sum(partials) / n


def _reference(pred_depth, pred_logvar, gt_depth, eps=1e-6):
    pred = jnp.maximum(pred_depth.astype(jnp.float32), eps)
    gt = jnp.maximum(gt_depth.astype(jnp.float32), eps)
    diff = jnp.log(gt) - jnp.log(pred)
    loss = 0.5 * jnp.exp(-pred_logvar.astype(jnp.float32)) * diff**2 \
        + 0.5 * pred_logvar.astype(jnp.float32)
    return jnp.mean(loss)


def _run_case(key, shape, **kwargs):
    k1, k2, k3 = jax.random.split(key, 3)
    pred_depth = jax.random.uniform(k1, shape, jnp.float32, 0.0, 10.0)
    gt_depth = jax.random.uniform(k2, shape, jnp.float32, 0.0, 10.0)
    pred_logvar = jax.random.normal(k3, shape, jnp.float32)

    out = nll_log_loss(pred_depth, pred_logvar, gt_depth, **kwargs)
    out = jax.block_until_ready(out)
    ref = _reference(pred_depth, pred_logvar, gt_depth)
    assert jnp.allclose(out, ref, rtol=1e-4, atol=1e-5), (shape, out, ref)


if __name__ == "__main__":
    key = jax.random.PRNGKey(0)
    keys = jax.random.split(key, 4)

    # Primary shape implied by the module: (B, 1, H, W) depth maps.
    _run_case(keys[0], (2, 1, 16, 16))
    # Exercises the (8,128)-fold accumulation path (rows multiple of 8).
    _run_case(keys[1], (2, 1, 32, 64))
    # Exercises the minimal lane-pad path (n % 128 != 0).
    _run_case(keys[2], (2, 1, 15, 15))
    # Exercises multi-tile grid, 2-core-group split and the tail row mask.
    _run_case(keys[3], (2, 1, 96, 176), block_rows=64)

    print("KERNEL_OK")
</pallas_src>

<mosaic_0001>
module attributes {stable_mosaic.version = 11 : i64} {
  func.func @_nll_kernel(%arg0: i32, %arg1: i32, %arg2: memref<4x128xf32, #tpu.memory_space<vmem>>, %arg3: memref<4x128xf32, #tpu.memory_space<vmem>>, %arg4: memref<4x128xf32, #tpu.memory_space<vmem>>, %arg5: memref<1x8x128xf32, #tpu.memory_space<vmem>>) attributes {dimension_semantics = [#tpu.dimension_semantics<parallel>, #tpu.dimension_semantics<arbitrary>], iteration_bounds = array<i64: 1, 1>, scalar_prefetch = 0 : i64, scratch_operands = 0 : i64, tpu.core_type = #tpu.core_type<tc>, window_params = [{transform_indices = @transform_0, window_bounds = array<i64: 4, 128>}, {transform_indices = @transform_1, window_bounds = array<i64: 4, 128>}, {transform_indices = @transform_2, window_bounds = array<i64: 4, 128>}, {transform_indices = @transform_3, window_bounds = array<i64: 1, 8, 128>}]} {
    %c0_i32 = arith.constant 0 : i32
    %0 = arith.cmpi eq, %arg1, %c0_i32 : i32
    %1 = arith.extui %0 : i1 to i32
    %c0_i32_0 = arith.constant 0 : i32
    %2 = arith.cmpi ne, %1, %c0_i32_0 : i32
    scf.if %2 {
      %cst_17 = arith.constant 0.000000e+00 : f32
      %31 = vector.broadcast %cst_17 : f32 to vector<8x128xf32>
      %c0_18 = arith.constant 0 : index
      %c0_19 = arith.constant 0 : index
      %c0_20 = arith.constant 0 : index
      %32 = vector.load %arg5[%c0_18, %c0_19, %c0_20] : memref<1x8x128xf32, #tpu.memory_space<vmem>>, vector<1x8x128xf32>
      %33 = vector.shape_cast %32 : vector<1x8x128xf32> to vector<8x128xf32>
      %34 = vector.shape_cast %31 : vector<8x128xf32> to vector<1x8x128xf32>
      tpu.vector_store %arg5[%c0_18, %c0_19, %c0_20], %34 {strides = array<i32>} : memref<1x8x128xf32, #tpu.memory_space<vmem>>, vector<1x8x128xf32>,
    } else {
    }
    %c0 = arith.constant 0 : index
    %c0_1 = arith.constant 0 : index
    %3 = vector.load %arg2[%c0, %c0_1] : memref<4x128xf32, #tpu.memory_space<vmem>>, vector<4x128xf32>
    %c0_2 = arith.constant 0 : index
    %c0_3 = arith.constant 0 : index
    %4 = vector.load %arg4[%c0_2, %c0_3] : memref<4x128xf32, #tpu.memory_space<vmem>>, vector<4x128xf32>
    %c0_4 = arith.constant 0 : index
    %c0_5 = arith.constant 0 : index
    %5 = vector.load %arg3[%c0_4, %c0_5] : memref<4x128xf32, #tpu.memory_space<vmem>>, vector<4x128xf32>
    %cst = arith.constant 9.99999997E-7 : f32
    %6 = vector.broadcast %cst : f32 to vector<4x128xf32>
    %7 = arith.maximumf %3, %6 : vector<4x128xf32>
    %cst_6 = arith.constant 9.99999997E-7 : f32
    %8 = vector.broadcast %cst_6 : f32 to vector<4x128xf32>
    %9 = arith.maximumf %4, %8 : vector<4x128xf32>
    %10 = math.log %9 : vector<4x128xf32>
    %11 = math.log %7 : vector<4x128xf32>
    %12 = arith.subf %10, %11 : vector<4x128xf32>
    %cst_7 = arith.constant 0.000000e+00 : f32
    %13 = vector.broadcast %cst_7 : f32 to vector<4x128xf32>
    %14 = arith.subf %13, %5 : vector<4x128xf32>
    %15 = math.exp %14 : vector<4x128xf32>
    %cst_8 = arith.constant 5.000000e-01 : f32
    %16 = vector.broadcast %cst_8 : f32 to vector<4x128xf32>
    %17 = arith.mulf %16, %15 : vector<4x128xf32>
    %18 = arith.mulf %17, %12 : vector<4x128xf32>
    %19 = arith.mulf %18, %12 : vector<4x128xf32>
    %cst_9 = arith.constant 5.000000e-01 : f32
    %20 = vector.broadcast %cst_9 : f32 to vector<4x128xf32>
    %21 = arith.mulf %20, %5 : vector<4x128xf32>
    %22 = arith.addf %19, %21 : vector<4x128xf32>
    %c0_10 = arith.constant 0 : index
    %c0_11 = arith.constant 0 : index
    %c0_12 = arith.constant 0 : index
    %23 = vector.load %arg5[%c0_10, %c0_11, %c0_12] : memref<1x8x128xf32, #tpu.memory_space<vmem>>, vector<1x1x128xf32>
    %24 = vector.shape_cast %23 : vector<1x1x128xf32> to vector<1x128xf32>
    %cst_13 = arith.constant dense<0.000000e+00> : vector<128xf32>
    %25 = vector.multi_reduction <add>, %22, %cst_13 [0] : vector<4x128xf32> to vector<128xf32>
    %26 = vector.shape_cast %25 : vector<128xf32> to vector<1x128xf32>
    %27 = arith.addf %24, %26 : vector<1x128xf32>
    %c0_14 = arith.constant 0 : index
    %c0_15 = arith.constant 0 : index
    %c0_16 = arith.constant 0 : index
    %28 = vector.load %arg5[%c0_14, %c0_15, %c0_16] : memref<1x8x128xf32, #tpu.memory_space<vmem>>, vector<1x1x128xf32>
    %29 = vector.shape_cast %28 : vector<1x1x128xf32> to vector<1x128xf32>
    %30 = vector.shape_cast %27 : vector<1x128xf32> to vector<1x1x128xf32>
    tpu.vector_store %arg5[%c0_14, %c0_15, %c0_16], %30 {strides = array<i32>} : memref<1x8x128xf32, #tpu.memory_space<vmem>>, vector<1x1x128xf32>,
    return
  }
  func.func @transform_0(%arg0: i32, %arg1: i32) -> (i32, i32) {
    %c1_i32 = arith.constant 1 : i32
    %0 = arith.muli %arg0, %c1_i32 : i32
    %1 = arith.addi %0, %arg1 : i32
    %c0_i32 = arith.constant 0 : i32
    %2 = arith.minsi %1, %c0_i32 : i32
    %c0_i32_0 = arith.constant 0 : i32
    %c0_i32_1 = arith.constant 0 : i32
    return %2, %c0_i32_0 : i32, i32
  }
  func.func @transform_1(%arg0: i32, %arg1: i32) -> (i32, i32) {
    %c1_i32 = arith.constant 1 : i32
    %0 = arith.muli %arg0, %c1_i32 : i32
    %1 = arith.addi %0, %arg1 : i32
    %c0_i32 = arith.constant 0 : i32
    %2 = arith.minsi %1, %c0_i32 : i32
    %c0_i32_0 = arith.constant 0 : i32
    %c0_i32_1 = arith.constant 0 : i32
    return %2, %c0_i32_0 : i32, i32
  }
  func.func @transform_2(%arg0: i32, %arg1: i32) -> (i32, i32) {
    %c1_i32 = arith.constant 1 : i32
    %0 = arith.muli %arg0, %c1_i32 : i32
    %1 = arith.addi %0, %arg1 : i32
    %c0_i32 = arith.constant 0 : i32
    %2 = arith.minsi %1, %c0_i32 : i32
    %c0_i32_0 = arith.constant 0 : i32
    %c0_i32_1 = arith.constant 0 : i32
    return %2, %c0_i32_0 : i32, i32
  }
  func.func @transform_3(%arg0: i32, %arg1: i32) -> (i32, i32, i32) {
    %c0_i32 = arith.constant 0 : i32
    %c0_i32_0 = arith.constant 0 : i32
    %c0_i32_1 = arith.constant 0 : i32
    return %arg0, %c0_i32, %c0_i32_0 : i32, i32, i32
  }
}

</mosaic_0001>

<bundles_post_ra>
// kernel: tpu_custom_call.1
= control target key start
LH: loop header
LB: loop body
LE: loop exit
PB: predicated region body
PF: predicated region fallthrough
CT: control target
= control target key end

     0   :  { %8 = vsyncpa [#allocation3], 0  ;;  %s287_s0 = inlined_call_operand.hbm [shape: f32[4,128], index: 0, kind: input, shape index: {}]   ;;  %s288_s1 = inlined_call_operand.hbm [shape: f32[4,128], index: 1, kind: input, shape index: {}]   ;;  %s289_s2 = inlined_call_operand.vmem [shape: f32[4,128], index: 2, kind: input, shape index: {}]   ;;  %s290_s3 = inlined_call_operand.hbm [shape: f32[1,8,128], index: 3, kind: output, shape index: {}]  }
   0x1   :  { %9 = vsyncpa [#allocation6], 0 }
   0x2   :  { %10 = vsyncpa [#allocation4], 0  ;;  %s224_s12 = smov [#allocation2]   ;;  %s225_s14 = smov [#allocation5]  }
   0x3   :  { %s22_s13 = sshll.u32 %s224_s12, 4  ;;  %s37_s15 = sshll.u32 %s225_s14, 4  ;;  %s23_s13 = int_to_ptr.vmem [resolvable:$true] %s22_s13  ;;  %s38_s15 = int_to_ptr.vmem [resolvable:$true] %s37_s15 }
   0x4   :  { %s152_s18 = scalar_lea.hbm %s287_s0, 64 }
   0x5   :  { %p153_p0 = scmp.ne.s32.totalorder %s287_s0, %s152_s18  ;;  %p156_p1 = scmp.lt.u32.totalorder %s152_s18, %s287_s0 }
   0x7   :  { %p158_p2 = pnand %p156_p1, %p153_p0 }
   0x9   :  { %161 = shalt.err (!%p158_p2)
}
   0xa   :  { %s162_s23 = scalar_lea.vmem %s23_s13, 64  ;;  %p167_p4 = scmp.lt.s32.totalorder %s23_s13, %s23_s13 }
   0xb   :  { %p163_p3 = scmp.ne.s32.totalorder %s23_s13, %s162_s23  ;;  %p168_p5 = scmp.lt.s32.totalorder %s162_s23, %s162_s23 }
   0xd   :  { %p169_p6 = por %p168_p5, %p167_p4 }
   0xf   :  { %p170_p7 = pnand %p169_p6, %p163_p3 }
  0x11   :  { %173 = shalt.err (!%p170_p7)
}
  0x12   :  { %25 = dma.hbm_to_vmem [thread:$0]  %s287_s0, 64, %s23_s13, [#allocation3]  }
  0x13   :  { %s174_s28 = scalar_lea.hbm %s288_s1, 64 }
  0x14   :  { %p175_p8 = scmp.ne.s32.totalorder %s288_s1, %s174_s28  ;;  %p178_p9 = scmp.lt.u32.totalorder %s174_s28, %s288_s1 }
  0x16   :  { %p180_p10 = pnand %p178_p9, %p175_p8 }
  0x18   :  { %183 = shalt.err (!%p180_p10)
}
  0x19   :  { %s184_s6 = scalar_lea.vmem %s38_s15, 64  ;;  %p189_p12 = scmp.lt.s32.totalorder %s38_s15, %s38_s15 }
  0x1a   :  { %p185_p11 = scmp.ne.s32.totalorder %s38_s15, %s184_s6  ;;  %p190_p13 = scmp.lt.s32.totalorder %s184_s6, %s184_s6 }
  0x1c   :  { %p191_p0 = por %p190_p13, %p189_p12 }
  0x1e   :  { %p192_p1 = pnand %p191_p0, %p185_p11 }
  0x20   :  { %195 = shalt.err (!%p192_p1)
}
  0x21   :  { %40 = dma.hbm_to_vmem [thread:$0]  %s288_s1, 64, %s38_s15, [#allocation6]  }
  0x22   :  { %218 = dma.done.wait [#allocation3], 64  }
  0x23   :  { %219 = vsyncadd [#allocation3], 4294967232 }
  0x24   :  { %220 = dma.done.wait [#allocation6], 64  }
  0x25   :  { %221 = vsyncadd [#allocation6], 4294967232  ;;  %v226_v0 = vmov 0.0   ;;  %v87_v1 = vld [vmem:[#allocation2] sm:$0xf]  ;;  %vm106_vm0 = vcmask 1043456  }
  0x26   :  { %86 = vst [vmem:[#allocation7] sm:$0xff] %v226_v0  ;;  %v88_v2 = vld [vmem:[%s289_s2] sm:$0xf]  ;;  %v89_v3 = vld [vmem:[#allocation5] sm:$0xf]  ;;  %s227_s1 = smov [#allocation7]  }
  0x27   :  { %v90_v4 = vmax.f32 %v87_v1, 1e-06  ;;  %v91_v5 = vmax.f32 %v88_v2, 1e-06  ;;  %v97_v6 = vsub.f32 0.0, %v89_v3  ;;  %v103_v16 = vmul.f32 0.5, %v89_v3 }
  0x28   :  { %s122_s2 = sshll.u32 %s227_s1, 4  ;;  %s123_s2 = int_to_ptr.vmem [resolvable:$true] %s122_s2 }
  0x29   :  { %146 = vlog2.f32 %v91_v5  ;;  %v98_v7 = vmul.f32 1.442695, %v97_v6  ;;  %s196_s10 = scalar_lea.vmem %s123_s2, 128  ;;  %p201_p3 = scmp.lt.s32.totalorder %s123_s2, %s123_s2 }
  0x2a   :  { %148 = vlog2.f32 %v90_v4  ;;  %p197_p2 = scmp.ne.s32.totalorder %s123_s2, %s196_s10  ;;  %p202_p4 = scmp.lt.s32.totalorder %s196_s10, %s196_s10 }
  0x2b   :  { %150 = vpow2.f32 %v98_v7 }
  0x2c   :  { %p203_p5 = por %p202_p4, %p201_p3 }
  0x2d   :  { %v105_v25 = vld [vmem:[#allocation7] sm:$0x1] }
  0x2e   :  { %p204_p6 = pnand %p203_p5, %p197_p2 }
  0x33   :  { %v147_v8 = vpop.eup %146 }
  0x34   :  { %v149_v9 = vpop.eup %148  ;;  %v93_v10 = vmul.f32 0.6931472, %v147_v8 }
  0x35   :  { %v151_v11 = vpop.eup %150  ;;  %v95_v12 = vmul.f32 0.6931472, %v149_v9 }
  0x36   :  { %v100_v13 = vmul.f32 0.5, %v151_v11 }
  0x37   :  { %v96_v14 = vsub.f32 %v93_v10, %v95_v12 }
  0x39   :  { %v101_v15 = vmul.f32 %v100_v13, %v96_v14 }
  0x3b   :  { %v102_v17 = vmul.f32 %v101_v15, %v96_v14 }
  0x3d   :  { %v104_v18 = vadd.f32 %v103_v16, %v102_v17 }
  0x3f   :  { %v107_v19 = vsel %vm106_vm0, %v104_v18, 0.0 }
  0x40   :  { %v108_v20 = vrot.slane %v107_v19, 4 }
  0x42   :  { %v109_v21 = vadd.f32 %v108_v20, %v107_v19 }
  0x44   :  { %v110_v22 = vrot.slane %v109_v21, 2 }
  0x46   :  { %v111_v23 = vadd.f32 %v110_v22, %v109_v21 }
  0x48   :  { %v112_v24 = vrot.slane %v111_v23, 1 }
  0x4a   :  { %v113_v26 = vadd.f32 %v112_v24, %v111_v23 }
  0x4c   :  { %v114_v27 = vadd.f32 %v113_v26, %v105_v25 }
  0x4e   :  { %115 = vst [vmem:[#allocation7] sm:$0x1] %v114_v27 }
  0x4f   :  { %207 = shalt.err (!%p204_p6)
}
  0x50   :  { %s208_s13 = scalar_lea.hbm %s290_s3, 128 }
  0x51   :  { %p209_p7 = scmp.ne.s32.totalorder %s290_s3, %s208_s13  ;;  %p212_p8 = scmp.lt.u32.totalorder %s208_s13, %s290_s3 }
  0x53   :  { %p214_p9 = pnand %p212_p8, %p209_p7 }
  0x55   :  { %217 = shalt.err (!%p214_p9)
}
  0x56   :  { %125 = dma.vmem_to_hbm [thread:$0]  %s123_s2, 128, %s290_s3, [#allocation4]  }
  0x57   :  { %222 = dma.done.wait [#allocation4], 128  }
  0x58   :  { %223 = vsyncadd [#allocation4], 4294967168 }
  0x59   :  { %129 = vsyncpa [#allocation3], 1 }
  0x5a   :  { %130 = vsyncpa [#allocation6], 1 }
  0x5b   :  { %131 = vsyncpa [#allocation4], 1 }

</bundles_post_ra>
